<compile_context>
chip_gen: v7x
topology: tpu7x:2x2x1
jax: 0.10.0
libtpu: 0.0.40
codegen_flags: <defaults>
</compile_context>

<pallas_src>
import functools

import jax
import jax.numpy as jnp
from jax.experimental import pallas as pl
from jax.experimental.pallas import tpu as pltpu


def _ts_model_kernel(xs_ref,       # (S, TB, D)  centered, segmented, time-major (matmul dtype)
                     wemb_ref,     # (D, H)      matmul dtype
                     bemb_ref,     # (1, H)      f32
                     wih_ref,      # (H, 4H)     matmul dtype, gate order [i,f,o,g], g cols *2
                     whh_ref,      # (H, 4H)     f32,          gate order [i,f,o,g], g cols *2
                     blstm_ref,    # (1, 4H)     f32,          gate order [i,f,o,g], g cols *2
                     wfc_ref,      # (H, O_pad)  f32, zero-padded output columns
                     bfc_ref,      # (1, O_pad)  f32, zero-padded output columns
                     logits_ref):  # (TB, O_pad) f32 out
    S, TB, D = xs_ref.shape
    H = whh_ref.shape[0]

    # ---- hoisted input-side work: two big (S*TB)-row MXU matmuls ------------
    # (S, TB, D) -> (S*TB, D) is a contiguous collapse of the leading dims.
    xs_flat = xs_ref[...].reshape(S * TB, D)
    emb = jnp.dot(xs_flat, wemb_ref[...],
                  preferred_element_type=jnp.float32) + bemb_ref[...]
    emb = jnp.maximum(emb, 0.0)                                    # ReLU (f32)
    gates_x = jnp.dot(emb.astype(wih_ref.dtype), wih_ref[...],
                      preferred_element_type=jnp.float32) + blstm_ref[...]
    # gates_x: (S*TB, 4H); rows [s*TB:(s+1)*TB] = timestep s; cols [i|f|o|2*g].

    whh = whh_ref[...]
    h = jnp.zeros((TB, H), jnp.float32)
    c = jnp.zeros((TB, H), jnp.float32)

    # ---- tiny serial recurrence, fully unrolled (S is static at trace time) -
    # TODO(synk): for very long sequences, stream xs / gates_x over S-chunks
    # with pltpu.emit_pipeline instead of holding all of gates_x in VMEM.
    for s in range(S):
        gx = gates_x[s * TB:(s + 1) * TB, :]                       # static slice
        gates = gx + jnp.dot(h, whh, preferred_element_type=jnp.float32)
        sig = jax.nn.sigmoid(gates)                                # ONE full-vreg EUP pass
        i_g = sig[:, 0 * H:1 * H]
        f_g = sig[:, 1 * H:2 * H]
        o_g = sig[:, 2 * H:3 * H]
        g_g = 2.0 * sig[:, 3 * H:4 * H] - 1.0                      # tanh(z) = 2*sigmoid(2z)-1
        c = f_g * c + i_g * g_g
        h = o_g * jnp.tanh(c)

    # ---- final projection (lane-dense: O padded to a multiple of 128) -------
    logits_ref[...] = (jnp.dot(h, wfc_ref[...],
                               preferred_element_type=jnp.float32)
                       + bfc_ref[...])


class TimeSeriesModelPallas:
    """Deterministically initialized JAX/Pallas port of TimeSeriesModel."""

    def __init__(self, input_dim=4, hidden_dim=32, output_dim=32, seg_length=60,
                 matmul_dtype=jnp.bfloat16):
        self.input_dim = input_dim
        self.hidden_dim = hidden_dim
        self.output_dim = output_dim
        self.seg_length = seg_length
        self.matmul_dtype = matmul_dtype

        D = input_dim * seg_length
        H = hidden_dim
        O = output_dim
        self.O_pad = -(-O // 128) * 128                     # lane-dense output width

        key = jax.random.PRNGKey(42)
        ks = jax.random.split(key, 8)

        def u(k, shape, fan_in):
            bound = 1.0 / jnp.sqrt(jnp.float32(fan_in))
            return jax.random.uniform(k, shape, jnp.float32, -bound, bound)

        # --- base (PyTorch-layout) parameters, used by the f32 reference -----
        # nn.Linear(D, H): weight (H, D) -> stored transposed (D, H)
        self.w_emb = u(ks[0], (D, H), D)
        self.b_emb = u(ks[1], (1, H), D)
        # nn.LSTM(H, H): weight_ih_l0 / weight_hh_l0 (4H, H) -> transposed;
        # PyTorch gate order along 4H is [i, f, g, o].
        self.w_ih = u(ks[2], (H, 4 * H), H)
        self.w_hh = u(ks[3], (H, 4 * H), H)
        b_ih = u(ks[4], (1, 4 * H), H)
        b_hh = u(ks[5], (1, 4 * H), H)
        self.b_lstm = b_ih + b_hh
        # nn.Linear(H, O)
        self.w_fc = u(ks[6], (H, O), H)
        self.b_fc = u(ks[7], (1, O), H)
        # latitude: linspace(-100, 100, O), shape (1, O)
        self.latitude = jnp.linspace(-100.0, 100.0, O,
                                     dtype=jnp.float32).reshape(1, O)

        # --- kernel-layout parameters ----------------------------------------
        # Permute gate columns [i, f, g, o] -> [i, f, o, g] and pre-scale the
        # g-gate columns by 2 so the kernel needs a single sigmoid pass
        # (tanh(z) = 2*sigmoid(2z) - 1).
        perm = jnp.concatenate([jnp.arange(0, 2 * H),        # i, f
                                jnp.arange(3 * H, 4 * H),    # o
                                jnp.arange(2 * H, 3 * H)])   # g
        scale = jnp.concatenate([jnp.ones((3 * H,), jnp.float32),
                                 jnp.full((H,), 2.0, jnp.float32)])
        self.w_emb_k = self.w_emb.astype(matmul_dtype)
        self.w_ih_k = (self.w_ih[:, perm] * scale).astype(matmul_dtype)
        self.w_hh_k = self.w_hh[:, perm] * scale             # f32 (recurrence stays f32)
        self.b_lstm_k = self.b_lstm[:, perm] * scale         # f32
        # zero-pad fc to O_pad columns for unmasked full-lane stores
        self.w_fc_k = jnp.zeros((H, self.O_pad), jnp.float32).at[:, :O].set(self.w_fc)
        self.b_fc_k = jnp.zeros((1, self.O_pad), jnp.float32).at[:, :O].set(self.b_fc)

    @functools.partial(jax.jit, static_argnums=0)
    def __call__(self, x):
        B, T, C = x.shape
        L = self.seg_length
        assert T % L == 0, "T must be a multiple of seg_length"
        assert C >= 4, "channel index 3 is hard-coded (input_dim >= 4 required)"
        S = T // L
        D = L * C
        H = self.hidden_dim
        O = self.output_dim
        Op = self.O_pad
        mm_itemsize = jnp.dtype(self.matmul_dtype).itemsize

        # ---- XLA-side glue (fuses into one input copy): centering,
        #      segmentation, time-major transpose, bf16 cast, batch pad -------
        x_last = x[:, -1, 3].reshape(B, 1)                          # (B, 1)
        x_centered = (x - x_last[:, :, None]).astype(jnp.float32)   # (B, T, C)
        xs = x_centered.reshape(B, S, D)                            # (B, S, D)
        xs = jnp.transpose(xs, (1, 0, 2))                           # (S, B, D)
        xs = xs.astype(self.matmul_dtype)                           # halve xs HBM/VMEM

        # batch tile: multiple of 8 sublanes, capped at 64 (vreg/VMEM pressure,
        # >=2 grid steps for the v7x megacore once B > 64, bounded pad waste)
        TB = min(64, -(-B // 8) * 8)
        B_pad = -(-B // TB) * TB
        if B_pad != B:
            xs = jnp.pad(xs, ((0, 0), (0, B_pad - B), (0, 0)))
        n_btiles = B_pad // TB

        # ---- VMEM budget (double-buffered xs block + in-kernel temporaries) -
        xs_block_bytes = 2 * S * TB * D * mm_itemsize
        tmp_bytes = S * TB * (5 * H) * 4 + S * TB * H * mm_itemsize   # emb f32 + gates_x f32 + emb cast
        w_bytes = ((D * H + H * 4 * H) * mm_itemsize
                   + (H * 4 * H + H * Op) * 4 + (5 * H + Op) * 4)
        out_bytes = 2 * TB * Op * 4
        vmem_needed = xs_block_bytes + tmp_bytes + 2 * w_bytes + out_bytes
        vmem_limit = max(32 * 1024 * 1024,
                         min(int(1.5 * vmem_needed) + (4 << 20), 64 * 1024 * 1024))

        flops = int(2 * S * B_pad * D * H            # xs @ w_emb
                    + 2 * S * B_pad * H * 4 * H      # emb @ w_ih
                    + 2 * S * B_pad * H * 4 * H      # h @ w_hh (per step)
                    + 2 * B_pad * H * Op)            # h @ w_fc
        transcendentals = int(S * B_pad * 5 * H)     # 4H sigmoid + H tanh per step
        bytes_accessed = int(S * B_pad * D * mm_itemsize + w_bytes + B_pad * Op * 4)

        full = lambda b: (0, 0)  # weights: whole-array blocks, VMEM-resident
        logits_pad = pl.pallas_call(
            _ts_model_kernel,
            out_shape=jax.ShapeDtypeStruct((B_pad, Op), jnp.float32),
            grid_spec=pltpu.PrefetchScalarGridSpec(
                num_scalar_prefetch=0,
                grid=(n_btiles,),
                in_specs=[
                    pl.BlockSpec((S, TB, D), lambda b: (0, b, 0)),   # xs
                    pl.BlockSpec((D, H), full),                      # w_emb
                    pl.BlockSpec((1, H), full),                      # b_emb
                    pl.BlockSpec((H, 4 * H), full),                  # w_ih
                    pl.BlockSpec((H, 4 * H), full),                  # w_hh
                    pl.BlockSpec((1, 4 * H), full),                  # b_lstm
                    pl.BlockSpec((H, Op), full),                     # w_fc (padded)
                    pl.BlockSpec((1, Op), full),                     # b_fc (padded)
                ],
                out_specs=pl.BlockSpec((TB, Op), lambda b: (b, 0)),
            ),
            compiler_params=pltpu.CompilerParams(
                dimension_semantics=("parallel",),
                vmem_limit_bytes=vmem_limit),
            cost_estimate=pl.CostEstimate(
                flops=flops, transcendentals=transcendentals,
                bytes_accessed=bytes_accessed),
        )(xs, self.w_emb_k, self.b_emb,
          self.w_ih_k, self.w_hh_k, self.b_lstm_k,
          self.w_fc_k, self.b_fc_k)

        logits = logits_pad[:B, :O]
        # independent of the LSTM: computed in XLA (fuses with the centering)
        levels = x_last * self.latitude                             # (B, O)
        return logits, levels

    # pure-JAX f32 reference (PyTorch gate order / layout) for verification
    def reference(self, x):
        B, T, C = x.shape
        L = self.seg_length
        S = T // L
        H = self.hidden_dim
        x_last = x[:, -1, 3].reshape(B, 1)
        xs = (x - x_last[:, :, None]).reshape(B, S, L * C)
        emb = jnp.maximum(xs @ self.w_emb + self.b_emb, 0.0)        # (B, S, H)
        h = jnp.zeros((B, H), jnp.float32)
        c = jnp.zeros((B, H), jnp.float32)
        for s in range(S):
            gates = emb[:, s, :] @ self.w_ih + h @ self.w_hh + self.b_lstm
            i_g = jax.nn.sigmoid(gates[:, 0 * H:1 * H])
            f_g = jax.nn.sigmoid(gates[:, 1 * H:2 * H])
            g_g = jnp.tanh(gates[:, 2 * H:3 * H])
            o_g = jax.nn.sigmoid(gates[:, 3 * H:4 * H])
            c = f_g * c + i_g * g_g
            h = o_g * jnp.tanh(c)
        return h @ self.w_fc + self.b_fc, x_last * self.latitude


if __name__ == "__main__":
    # small shapes consistent with the module's forward
    B, C, L, S = 2, 4, 8, 4          # batch, channels(input_dim), seg_length, segments
    T = L * S                        # 32 time steps
    H, O = 32, 32

    key = jax.random.PRNGKey(0)
    x = jax.random.normal(key, (B, T, C), dtype=jnp.float32)

    # default (bf16 matmul inputs, f32 accumulation / recurrence)
    model = TimeSeriesModelPallas(input_dim=C, hidden_dim=H,
                                  output_dim=O, seg_length=L)
    logits, levels = model(x)
    jax.block_until_ready((logits, levels))
    ref_logits, ref_levels = model.reference(x)
    assert logits.shape == (B, O) and levels.shape == (B, O)
    assert jnp.allclose(logits, ref_logits, rtol=5e-2, atol=5e-2)   # bf16 inputs
    assert jnp.allclose(levels, ref_levels, rtol=1e-3, atol=1e-3)

    # exact-path sanity check (f32 matmuls) against the same reference
    model_f32 = TimeSeriesModelPallas(input_dim=C, hidden_dim=H,
                                      output_dim=O, seg_length=L,
                                      matmul_dtype=jnp.float32)
    logits32, levels32 = model_f32(x)
    jax.block_until_ready((logits32, levels32))
    assert jnp.allclose(logits32, ref_logits, rtol=1e-3, atol=1e-3)
    assert jnp.allclose(levels32, ref_levels, rtol=1e-3, atol=1e-3)

    print("KERNEL_OK")
</pallas_src>

<mosaic_0001>
module attributes {stable_mosaic.version = 11 : i64} {
  func.func @_ts_model_kernel(%arg0: i32, %arg1: memref<4x8x32xbf16, #tpu.memory_space<vmem>>, %arg2: memref<32x32xbf16, #tpu.memory_space<vmem>>, %arg3: memref<1x32xf32, #tpu.memory_space<vmem>>, %arg4: memref<32x128xbf16, #tpu.memory_space<vmem>>, %arg5: memref<32x128xf32, #tpu.memory_space<vmem>>, %arg6: memref<1x128xf32, #tpu.memory_space<vmem>>, %arg7: memref<32x128xf32, #tpu.memory_space<vmem>>, %arg8: memref<1x128xf32, #tpu.memory_space<vmem>>, %arg9: memref<8x128xf32, #tpu.memory_space<vmem>>) attributes {dimension_semantics = [#tpu.dimension_semantics<parallel>], iteration_bounds = array<i64: 1>, scalar_prefetch = 0 : i64, scratch_operands = 0 : i64, tpu.core_type = #tpu.core_type<tc>, window_params = [{transform_indices = @transform_0, window_bounds = array<i64: 4, 8, 32>}, {pipeline_mode = #tpu.pipeline_mode<synchronous>, transform_indices = @transform_1, window_bounds = array<i64: 32, 32>}, {pipeline_mode = #tpu.pipeline_mode<synchronous>, transform_indices = @transform_2, window_bounds = array<i64: 1, 32>}, {pipeline_mode = #tpu.pipeline_mode<synchronous>, transform_indices = @transform_3, window_bounds = array<i64: 32, 128>}, {pipeline_mode = #tpu.pipeline_mode<synchronous>, transform_indices = @transform_4, window_bounds = array<i64: 32, 128>}, {pipeline_mode = #tpu.pipeline_mode<synchronous>, transform_indices = @transform_5, window_bounds = array<i64: 1, 128>}, {pipeline_mode = #tpu.pipeline_mode<synchronous>, transform_indices = @transform_6, window_bounds = array<i64: 32, 128>}, {pipeline_mode = #tpu.pipeline_mode<synchronous>, transform_indices = @transform_7, window_bounds = array<i64: 1, 128>}, {transform_indices = @transform_8, window_bounds = array<i64: 8, 128>}]} {
    %c0 = arith.constant 0 : index
    %c0_0 = arith.constant 0 : index
    %c0_1 = arith.constant 0 : index
    %0 = vector.load %arg1[%c0, %c0_0, %c0_1] : memref<4x8x32xbf16, #tpu.memory_space<vmem>>, vector<4x8x32xbf16>
    %1 = vector.shape_cast %0 : vector<4x8x32xbf16> to vector<32x32xbf16>
    %c0_2 = arith.constant 0 : index
    %c0_3 = arith.constant 0 : index
    %2 = vector.load %arg2[%c0_2, %c0_3] : memref<32x32xbf16, #tpu.memory_space<vmem>>, vector<32x32xbf16>
    %cst = arith.constant dense<0.000000e+00> : vector<32x32xf32>
    %3 = tpu.matmul %1, %2, %cst {dimension_numbers = #tpu.dot_dimension_numbers<[1], [0], [0], [1], [0, 0, 1, 1], [], []>} : vector<32x32xbf16>, vector<32x32xbf16>, vector<32x32xf32> -> vector<32x32xf32>
    %c0_4 = arith.constant 0 : index
    %c0_5 = arith.constant 0 : index
    %4 = vector.load %arg3[%c0_4, %c0_5] : memref<1x32xf32, #tpu.memory_space<vmem>>, vector<1x32xf32>
    %5 = vector.broadcast %4 : vector<1x32xf32> to vector<32x32xf32>
    %6 = arith.addf %3, %5 : vector<32x32xf32>
    %cst_6 = arith.constant 0.000000e+00 : f32
    %7 = vector.broadcast %cst_6 : f32 to vector<32x32xf32>
    %8 = arith.maximumf %6, %7 : vector<32x32xf32>
    %9 = arith.truncf %8 : vector<32x32xf32> to vector<32x32xbf16>
    %c0_7 = arith.constant 0 : index
    %c0_8 = arith.constant 0 : index
    %10 = vector.load %arg4[%c0_7, %c0_8] : memref<32x128xbf16, #tpu.memory_space<vmem>>, vector<32x128xbf16>
    %cst_9 = arith.constant dense<0.000000e+00> : vector<32x128xf32>
    %11 = tpu.matmul %9, %10, %cst_9 {dimension_numbers = #tpu.dot_dimension_numbers<[1], [0], [0], [1], [0, 0, 1, 1], [], []>} : vector<32x32xbf16>, vector<32x128xbf16>, vector<32x128xf32> -> vector<32x128xf32>
    %c0_10 = arith.constant 0 : index
    %c0_11 = arith.constant 0 : index
    %12 = vector.load %arg6[%c0_10, %c0_11] : memref<1x128xf32, #tpu.memory_space<vmem>>, vector<1x128xf32>
    %13 = vector.broadcast %12 : vector<1x128xf32> to vector<32x128xf32>
    %14 = arith.addf %11, %13 : vector<32x128xf32>
    %c0_12 = arith.constant 0 : index
    %c0_13 = arith.constant 0 : index
    %15 = vector.load %arg5[%c0_12, %c0_13] : memref<32x128xf32, #tpu.memory_space<vmem>>, vector<32x128xf32>
    %cst_14 = arith.constant 0.000000e+00 : f32
    %16 = vector.broadcast %cst_14 : f32 to vector<8x32xf32>
    %cst_15 = arith.constant 0.000000e+00 : f32
    %17 = vector.broadcast %cst_15 : f32 to vector<8x32xf32>
    %18 = vector.extract_strided_slice %14 {offsets = [0, 0], sizes = [8, 128], strides = [1, 1]} : vector<32x128xf32> to vector<8x128xf32>
    %cst_16 = arith.constant dense<0.000000e+00> : vector<8x128xf32>
    %19 = tpu.matmul %16, %15, %cst_16 {dimension_numbers = #tpu.dot_dimension_numbers<[1], [0], [0], [1], [0, 0, 1, 1], [], []>} : vector<8x32xf32>, vector<32x128xf32>, vector<8x128xf32> -> vector<8x128xf32>
    %20 = arith.addf %18, %19 : vector<8x128xf32>
    %21 = arith.negf %20 : vector<8x128xf32>
    %22 = math.exp %21 : vector<8x128xf32>
    %cst_17 = arith.constant 1.000000e+00 : f32
    %23 = vector.broadcast %cst_17 : f32 to vector<8x128xf32>
    %24 = arith.addf %23, %22 : vector<8x128xf32>
    %25 = arith.divf %23, %24 : vector<8x128xf32>
    %26 = vector.extract_strided_slice %25 {offsets = [0, 0], sizes = [8, 32], strides = [1, 1]} : vector<8x128xf32> to vector<8x32xf32>
    %27 = vector.extract_strided_slice %25 {offsets = [0, 32], sizes = [8, 32], strides = [1, 1]} : vector<8x128xf32> to vector<8x32xf32>
    %28 = vector.extract_strided_slice %25 {offsets = [0, 64], sizes = [8, 32], strides = [1, 1]} : vector<8x128xf32> to vector<8x32xf32>
    %29 = vector.extract_strided_slice %25 {offsets = [0, 96], sizes = [8, 32], strides = [1, 1]} : vector<8x128xf32> to vector<8x32xf32>
    %cst_18 = arith.constant 2.000000e+00 : f32
    %30 = vector.broadcast %cst_18 : f32 to vector<8x32xf32>
    %31 = arith.mulf %30, %29 : vector<8x32xf32>
    %cst_19 = arith.constant 1.000000e+00 : f32
    %32 = vector.broadcast %cst_19 : f32 to vector<8x32xf32>
    %33 = arith.subf %31, %32 : vector<8x32xf32>
    %34 = arith.mulf %27, %17 : vector<8x32xf32>
    %35 = arith.mulf %26, %33 : vector<8x32xf32>
    %36 = arith.addf %34, %35 : vector<8x32xf32>
    %37 = math.tanh %36 : vector<8x32xf32>
    %38 = arith.mulf %28, %37 : vector<8x32xf32>
    %39 = vector.extract_strided_slice %14 {offsets = [8, 0], sizes = [8, 128], strides = [1, 1]} : vector<32x128xf32> to vector<8x128xf32>
    %cst_20 = arith.constant dense<0.000000e+00> : vector<8x128xf32>
    %40 = tpu.matmul %38, %15, %cst_20 {dimension_numbers = #tpu.dot_dimension_numbers<[1], [0], [0], [1], [0, 0, 1, 1], [], []>} : vector<8x32xf32>, vector<32x128xf32>, vector<8x128xf32> -> vector<8x128xf32>
    %41 = arith.addf %39, %40 : vector<8x128xf32>
    %42 = arith.negf %41 : vector<8x128xf32>
    %43 = math.exp %42 : vector<8x128xf32>
    %cst_21 = arith.constant 1.000000e+00 : f32
    %44 = vector.broadcast %cst_21 : f32 to vector<8x128xf32>
    %45 = arith.addf %44, %43 : vector<8x128xf32>
    %46 = arith.divf %44, %45 : vector<8x128xf32>
    %47 = vector.extract_strided_slice %46 {offsets = [0, 0], sizes = [8, 32], strides = [1, 1]} : vector<8x128xf32> to vector<8x32xf32>
    %48 = vector.extract_strided_slice %46 {offsets = [0, 32], sizes = [8, 32], strides = [1, 1]} : vector<8x128xf32> to vector<8x32xf32>
    %49 = vector.extract_strided_slice %46 {offsets = [0, 64], sizes = [8, 32], strides = [1, 1]} : vector<8x128xf32> to vector<8x32xf32>
    %50 = vector.extract_strided_slice %46 {offsets = [0, 96], sizes = [8, 32], strides = [1, 1]} : vector<8x128xf32> to vector<8x32xf32>
    %cst_22 = arith.constant 2.000000e+00 : f32
    %51 = vector.broadcast %cst_22 : f32 to vector<8x32xf32>
    %52 = arith.mulf %51, %50 : vector<8x32xf32>
    %cst_23 = arith.constant 1.000000e+00 : f32
    %53 = vector.broadcast %cst_23 : f32 to vector<8x32xf32>
    %54 = arith.subf %52, %53 : vector<8x32xf32>
    %55 = arith.mulf %48, %36 : vector<8x32xf32>
    %56 = arith.mulf %47, %54 : vector<8x32xf32>
    %57 = arith.addf %55, %56 : vector<8x32xf32>
    %58 = math.tanh %57 : vector<8x32xf32>
    %59 = arith.mulf %49, %58 : vector<8x32xf32>
    %60 = vector.extract_strided_slice %14 {offsets = [16, 0], sizes = [8, 128], strides = [1, 1]} : vector<32x128xf32> to vector<8x128xf32>
    %cst_24 = arith.constant dense<0.000000e+00> : vector<8x128xf32>
    %61 = tpu.matmul %59, %15, %cst_24 {dimension_numbers = #tpu.dot_dimension_numbers<[1], [0], [0], [1], [0, 0, 1, 1], [], []>} : vector<8x32xf32>, vector<32x128xf32>, vector<8x128xf32> -> vector<8x128xf32>
    %62 = arith.addf %60, %61 : vector<8x128xf32>
    %63 = arith.negf %62 : vector<8x128xf32>
    %64 = math.exp %63 : vector<8x128xf32>
    %cst_25 = arith.constant 1.000000e+00 : f32
    %65 = vector.broadcast %cst_25 : f32 to vector<8x128xf32>
    %66 = arith.addf %65, %64 : vector<8x128xf32>
    %67 = arith.divf %65, %66 : vector<8x128xf32>
    %68 = vector.extract_strided_slice %67 {offsets = [0, 0], sizes = [8, 32], strides = [1, 1]} : vector<8x128xf32> to vector<8x32xf32>
    %69 = vector.extract_strided_slice %67 {offsets = [0, 32], sizes = [8, 32], strides = [1, 1]} : vector<8x128xf32> to vector<8x32xf32>
    %70 = vector.extract_strided_slice %67 {offsets = [0, 64], sizes = [8, 32], strides = [1, 1]} : vector<8x128xf32> to vector<8x32xf32>
    %71 = vector.extract_strided_slice %67 {offsets = [0, 96], sizes = [8, 32], strides = [1, 1]} : vector<8x128xf32> to vector<8x32xf32>
    %cst_26 = arith.constant 2.000000e+00 : f32
    %72 = vector.broadcast %cst_26 : f32 to vector<8x32xf32>
    %73 = arith.mulf %72, %71 : vector<8x32xf32>
    %cst_27 = arith.constant 1.000000e+00 : f32
    %74 = vector.broadcast %cst_27 : f32 to vector<8x32xf32>
    %75 = arith.subf %73, %74 : vector<8x32xf32>
    %76 = arith.mulf %69, %57 : vector<8x32xf32>
    %77 = arith.mulf %68, %75 : vector<8x32xf32>
    %78 = arith.addf %76, %77 : vector<8x32xf32>
    %79 = math.tanh %78 : vector<8x32xf32>
    %80 = arith.mulf %70, %79 : vector<8x32xf32>
    %81 = vector.extract_strided_slice %14 {offsets = [24, 0], sizes = [8, 128], strides = [1, 1]} : vector<32x128xf32> to vector<8x128xf32>
    %cst_28 = arith.constant dense<0.000000e+00> : vector<8x128xf32>
    %82 = tpu.matmul %80, %15, %cst_28 {dimension_numbers = #tpu.dot_dimension_numbers<[1], [0], [0], [1], [0, 0, 1, 1], [], []>} : vector<8x32xf32>, vector<32x128xf32>, vector<8x128xf32> -> vector<8x128xf32>
    %83 = arith.addf %81, %82 : vector<8x128xf32>
    %84 = arith.negf %83 : vector<8x128xf32>
    %85 = math.exp %84 : vector<8x128xf32>
    %cst_29 = arith.constant 1.000000e+00 : f32
    %86 = vector.broadcast %cst_29 : f32 to vector<8x128xf32>
    %87 = arith.addf %86, %85 : vector<8x128xf32>
    %88 = arith.divf %86, %87 : vector<8x128xf32>
    %89 = vector.extract_strided_slice %88 {offsets = [0, 0], sizes = [8, 32], strides = [1, 1]} : vector<8x128xf32> to vector<8x32xf32>
    %90 = vector.extract_strided_slice %88 {offsets = [0, 32], sizes = [8, 32], strides = [1, 1]} : vector<8x128xf32> to vector<8x32xf32>
    %91 = vector.extract_strided_slice %88 {offsets = [0, 64], sizes = [8, 32], strides = [1, 1]} : vector<8x128xf32> to vector<8x32xf32>
    %92 = vector.extract_strided_slice %88 {offsets = [0, 96], sizes = [8, 32], strides = [1, 1]} : vector<8x128xf32> to vector<8x32xf32>
    %cst_30 = arith.constant 2.000000e+00 : f32
    %93 = vector.broadcast %cst_30 : f32 to vector<8x32xf32>
    %94 = arith.mulf %93, %92 : vector<8x32xf32>
    %cst_31 = arith.constant 1.000000e+00 : f32
    %95 = vector.broadcast %cst_31 : f32 to vector<8x32xf32>
    %96 = arith.subf %94, %95 : vector<8x32xf32>
    %97 = arith.mulf %90, %78 : vector<8x32xf32>
    %98 = arith.mulf %89, %96 : vector<8x32xf32>
    %99 = arith.addf %97, %98 : vector<8x32xf32>
    %100 = math.tanh %99 : vector<8x32xf32>
    %101 = arith.mulf %91, %100 : vector<8x32xf32>
    %c0_32 = arith.constant 0 : index
    %c0_33 = arith.constant 0 : index
    %102 = vector.load %arg7[%c0_32, %c0_33] : memref<32x128xf32, #tpu.memory_space<vmem>>, vector<32x128xf32>
    %cst_34 = arith.constant dense<0.000000e+00> : vector<8x128xf32>
    %103 = tpu.matmul %101, %102, %cst_34 {dimension_numbers = #tpu.dot_dimension_numbers<[1], [0], [0], [1], [0, 0, 1, 1], [], []>} : vector<8x32xf32>, vector<32x128xf32>, vector<8x128xf32> -> vector<8x128xf32>
    %c0_35 = arith.constant 0 : index
    %c0_36 = arith.constant 0 : index
    %104 = vector.load %arg8[%c0_35, %c0_36] : memref<1x128xf32, #tpu.memory_space<vmem>>, vector<1x128xf32>
    %105 = vector.broadcast %104 : vector<1x128xf32> to vector<8x128xf32>
    %106 = arith.addf %103, %105 : vector<8x128xf32>
    %c0_37 = arith.constant 0 : index
    %c0_38 = arith.constant 0 : index
    %107 = vector.load %arg9[%c0_37, %c0_38] : memref<8x128xf32, #tpu.memory_space<vmem>>, vector<8x128xf32>
    tpu.vector_store %arg9[%c0_37, %c0_38], %106 {strides = array<i32>} : memref<8x128xf32, #tpu.memory_space<vmem>>, vector<8x128xf32>,
    return
  }
  func.func @transform_0(%arg0: i32) -> (i32, i32, i32) {
    %c0_i32 = arith.constant 0 : i32
    %c0_i32_0 = arith.constant 0 : i32
    %c0_i32_1 = arith.constant 0 : i32
    return %c0_i32, %arg0, %c0_i32_0 : i32, i32, i32
  }
  func.func @transform_1(%arg0: i32) -> (i32, i32) {
    %c0_i32 = arith.constant 0 : i32
    %c0_i32_0 = arith.constant 0 : i32
    %c0_i32_1 = arith.constant 0 : i32
    return %c0_i32, %c0_i32_0 : i32, i32
  }
  func.func @transform_2(%arg0: i32) -> (i32, i32) {
    %c0_i32 = arith.constant 0 : i32
    %c0_i32_0 = arith.constant 0 : i32
    %c0_i32_1 = arith.constant 0 : i32
    return %c0_i32, %c0_i32_0 : i32, i32
  }
  func.func @transform_3(%arg0: i32) -> (i32, i32) {
    %c0_i32 = arith.constant 0 : i32
    %c0_i32_0 = arith.constant 0 : i32
    %c0_i32_1 = arith.constant 0 : i32
    return %c0_i32, %c0_i32_0 : i32, i32
  }
  func.func @transform_4(%arg0: i32) -> (i32, i32) {
    %c0_i32 = arith.constant 0 : i32
    %c0_i32_0 = arith.constant 0 : i32
    %c0_i32_1 = arith.constant 0 : i32
    return %c0_i32, %c0_i32_0 : i32, i32
  }
  func.func @transform_5(%arg0: i32) -> (i32, i32) {
    %c0_i32 = arith.constant 0 : i32
    %c0_i32_0 = arith.constant 0 : i32
    %c0_i32_1 = arith.constant 0 : i32
    return %c0_i32, %c0_i32_0 : i32, i32
  }
  func.func @transform_6(%arg0: i32) -> (i32, i32) {
    %c0_i32 = arith.constant 0 : i32
    %c0_i32_0 = arith.constant 0 : i32
    %c0_i32_1 = arith.constant 0 : i32
    return %c0_i32, %c0_i32_0 : i32, i32
  }
  func.func @transform_7(%arg0: i32) -> (i32, i32) {
    %c0_i32 = arith.constant 0 : i32
    %c0_i32_0 = arith.constant 0 : i32
    %c0_i32_1 = arith.constant 0 : i32
    return %c0_i32, %c0_i32_0 : i32, i32
  }
  func.func @transform_8(%arg0: i32) -> (i32, i32) {
    %c0_i32 = arith.constant 0 : i32
    %c0_i32_0 = arith.constant 0 : i32
    return %arg0, %c0_i32 : i32, i32
  }
}

</mosaic_0001>

<bundles_post_ra>
// kernel: a_call__.1
= control target key start
LH: loop header
LB: loop body
LE: loop exit
PB: predicated region body
PF: predicated region fallthrough
CT: control target
= control target key end

     0   :  { %vm67_vm0 = vcmask 261120   ;;  %v898_v8 = vmov 0.0|0.0   ;;  %vm899_vm1 = vmmov 0   ;;  %v900_v13 = vmov 0.0   ;;  %s902_s24 = smov 64   ;;  %s1065_s1 = inlined_call_operand.vmem [shape: bf16[32,32], index: 1, kind: input, shape index: {}]   ;;  %s1066_s0 = inlined_call_operand.vmem [shape: bf16[4,8,32], index: 0, kind: input, shape index: {}]   ;;  %s1067_s3 = inlined_call_operand.vmem [shape: bf16[32,128], index: 3, kind: input, shape index: {}]   ;;  %s1068_s4 = inlined_call_operand.vmem [shape: f32[32,128], index: 4, kind: input, shape index: {}]   ;;  %s1069_s2 = inlined_call_operand.vmem [shape: f32[1,32], index: 2, kind: input, shape index: {}]   ;;  %s1070_s5 = inlined_call_operand.vmem [shape: f32[1,128], index: 5, kind: input, shape index: {}]   ;;  %s1071_s6 = inlined_call_operand.vmem [shape: f32[32,128], index: 6, kind: input, shape index: {}]   ;;  %s1072_s7 = inlined_call_operand.vmem [shape: f32[1,128], index: 7, kind: input, shape index: {}]   ;;  %s1073_s8 = inlined_call_operand.vmem [shape: f32[8,128], index: 8, kind: output, shape index: {}]  }
   0x1   :  { %v868_v0 = vld [vmem:[%s1065_s1] sm:$0xff]   ;;  %v869_v1 = vld [vmem:[%s1065_s1 + $0x8] sm:$0xff]   ;;  %v209_v10 = vld [vmem:[%s1068_s4 + $0x10] sm:$0xff] }
   0x2   :  { %762 = vmatprep.subr.bf16.mxu0 %v868_v0  ;;  %v870_v2 = vld [vmem:[%s1066_s0] sm:$0xff]   ;;  %v871_v3 = vld [vmem:[%s1066_s0 + $0x8] sm:$0xff]   ;;  %v210_v11 = vld [vmem:[%s1068_s4 + $0x18] sm:$0xff] }
   0x3   :  { %763 = vmatpush3.bf16.msra.mxu0 %v868_v0  ;;  %766 = vmatprep.mubr.msk.bf16.mxu0 %vm67_vm0, %v870_v2  ;;  %v872_v4 = vld [vmem:[%s1067_s3] sm:$0xff]   ;;  %v208_v6 = vld [vmem:[%s1068_s4 + $0x8] sm:$0xff]  ;;  %v985_v12 = vpack.c.bf16 %v210_v11, %v209_v10 }
   0x4   :  { %764 = vmatprep.subr.bf16.mxu0 %v869_v1  ;;  %770 = vmatprep.subr.bf16.mxu1 %v872_v4  ;;  %v207_v5 = vld [vmem:[%s1068_s4] sm:$0xff]  ;;  %v873_v9 = vld [vmem:[%s1067_s3 + $0x8] sm:$0xff]  }
   0x5   :  { %771 = vmatpush3.bf16.msra.mxu1 %v872_v4  ;;  %v971_v7 = vpack.c.bf16 %v208_v6, %v207_v5  ;;  %v704_v14 = vld [vmem:[%s1069_s2] ss:$0 sm:$0xff] }
   0x6   :  { %772 = vmatprep.subr.bf16.mxu1 %v873_v9  ;;  %v711_v31 = vld [vmem:[%s1070_s5] ss:$0 sm:$0xff]  ;;  %s901_s5 = smov 32  }
   0x7   :  { %765 = vmatpush3.bf16.msra.mxu0 %v869_v1 }
   0x8   :  { %833 = vmatprep.subr.bf16.mxu0 %v898_v8 }
   0x9   :  { %773 = vmatpush3.bf16.msra.mxu1 %v873_v9 }
   0xa   :  { %767 = vmatmul.mubr.msk.bf16.vlgmr.msra.gmra.mrb[0].mxu0 %vm67_vm0, %v871_v3  ;;  %839 = vmatprep.subr.bf16.mxu1 %v898_v8 }
   0xb   :  { %835 = vmatpush3.bf16.msra.mxu0 %v971_v7  ;;  %786 = vmatprep.mubr.msk.f32.mxu0 %vm899_vm1, %v900_v13 }
   0xc   :  { %836 = vmatprep.subr.bf16.mxu0 %v898_v8 }
   0xf   :  { %838 = vmatpush3.bf16.msra.mxu0 %v985_v12 }
  0x10   :  { %845 = vmatprep.subr.bf16.mxu0 %v898_v8 }
  0x12   :  { %787 = vmatmul.mubr.f32.vlgmr.msra.gmra.mrb[4].mxu0 %v900_v13 }
  0x13   :  { %847 = vmatpush3.bf16.msra.mxu0 %v971_v7  ;;  %808 = vmatprep.mubr.msk.f32.mxu0 %vm899_vm1, %v900_v13 }
  0x14   :  { %848 = vmatprep.subr.bf16.mxu0 %v898_v8 }
  0x17   :  { %850 = vmatpush3.bf16.msra.mxu0 %v985_v12 }
  0x18   :  { %857 = vmatprep.subr.bf16.mxu0 %v898_v8 }
  0xdd   :  { %v768_v15 = vpop.f32.mrb[0].mxu0 }
  0xde   :  { %v117_v16 = vadd.f32 %v768_v15, %v704_v14  ;;  %v108_v17 = vpop.f32.mrb[1].mxu0 }
  0xdf   :  { %v109_v18 = vadd.f32 %v704_v14, %v108_v17  ;;  %v769_v19 = vpop.f32.mrb[2].mxu0 }
  0xe0   :  { %v120_v20 = vadd.f32 %v769_v19, %v704_v14  ;;  %v111_v21 = vpop.f32.mrb[3].mxu0  ;;  %v125_v23 = vmax.f32 %v117_v16, 0.0 }
  0xe1   :  { %v112_v22 = vadd.f32 %v704_v14, %v111_v21  ;;  %v123_v25 = vmax.f32 %v109_v18, 0.0 }
  0xe2   :  { %v126_v24 = vmax.f32 %v120_v20, 0.0 }
  0xe3   :  { %v124_v26 = vmax.f32 %v112_v22, 0.0 }
  0xe4   :  { %v128_v27 = vpack.c.bf16 %v126_v24, %v125_v23 }
  0xe5   :  { %v127_v28 = vpack.c.bf16 %v124_v26, %v123_v25  ;;  %v280_v29 = vpop.f32.mrb[4].mxu0 }
  0xe6   :  { %v788_v30 = vpop.f32.mrb[5].mxu0 }
  0xe7   :  { %774 = vmatprep.mubr.msk.bf16.mxu1 %vm67_vm0, %v127_v28 }
  0xe8   :  { %775 = vmatmul.mubr.msk.bf16.vlgmr.msra.gmra.mrb[0].mxu1 %vm67_vm0, %v128_v27 }
  0xe9   :  { %841 = vmatpush3.bf16.msra.mxu1 %v971_v7  ;;  %797 = vmatprep.mubr.msk.f32.mxu1 %vm899_vm1, %v900_v13 }
  0xea   :  { %842 = vmatprep.subr.bf16.mxu1 %v898_v8 }
  0xed   :  { %844 = vmatpush3.bf16.msra.mxu1 %v985_v12 }
  0xee   :  { %851 = vmatprep.subr.bf16.mxu1 %v898_v8 }
 0x1bb   :  { %v776_v32 = vpop.f32.mrb[0].mxu1 }
 0x1bc   :  { %v1013_v33 = vadd.f32 %v776_v32, %v711_v31  ;;  %v192_v34 = vpop.f32.mrb[1].mxu1 }
 0x1bd   :  { %v193_v35 = vadd.f32 %v711_v31, %v192_v34  ;;  %v777_v36 = vpop.f32.mrb[2].mxu1 }
 0x1be   :  { %v1015_v37 = vadd.f32 %v777_v36, %v711_v31  ;;  %v195_v38 = vpop.f32.mrb[3].mxu1 }
 0x1bf   :  { %v284_v39 = vadd.f32 %v280_v29, %v193_v35  ;;  %v196_v40 = vadd.f32 %v711_v31, %v195_v38 }
 0x1c1   :  { %v716_v41 = vmul.f32 -1.442695, %v284_v39 }
 0x1c3   :  { %874 = vpow2.f32 %v716_v41 }
 0x1cd   :  { %v875_v42 = vpop.eup %874 }
 0x1ce   :  { %v288_v43 = vadd.f32 1.0, %v875_v42 }
 0x1d0   :  { %876 = vrcp.f32 %v288_v43 }
 0x1da   :  { %v877_v44 = vpop.eup %876 }
 0x1db   :  { %v291_v45 = vmul.f32 2.0, %v877_v44  ;;  %v293_v49 = vmul.f32 0.0, %v877_v44 }
 0x1dd   :  { %v717_v46 = vadd.f32 -1.0, %v291_v45  ;;  %v615_v45 = vld [vmem:[%s1071_s6 + $0x10] sm:$0xff] }
 0x1df   :  { %295 = vrot.lane.b32.xlu0 %v717_v46, %s901_s5 }
 0x251   :  { %v296_v47 = vpop.permute.xlu0 %295 }
 0x252   :  { %v298_v48 = vmul.f32 %v877_v44, %v296_v47  ;;  %v616_v47 = vld [vmem:[%s1071_s6 + $0x18] sm:$0xff] }
 0x254   :  { %300 = vrot.lane.b32.xlu0 %v298_v48, %s901_s5  ;;  %v861_v48 = vpack.c.bf16 %v616_v47, %v615_v45 }
 0x2c6   :  { %v301_v50 = vpop.permute.xlu0 %300 }
 0x2c7   :  { %v303_v51 = vadd.f32 %v301_v50, %v293_v49 }
 0x2c9   :  { %878 = vtanh.f32 %v303_v51 }
 0x2d3   :  { %v879_v52 = vpop.eup %878 }
 0x2d4   :  { %306 = vrot.lane.b32.xlu1 %v879_v52, %s901_s5 }
 0x346   :  { %v307_v53 = vpop.permute.xlu1 %306 }
 0x347   :  { %v309_v54 = vmul.f32 %v877_v44, %v307_v53  ;;  %v614_v44 = vld [vmem:[%s1071_s6 + $0x8] sm:$0xff]  ;;  %v727_v53 = vld [vmem:[%s1072_s7] ss:$0 sm:$0xff] }
 0x349   :  { %311 = vrot.lane.b32.xlu1 %v309_v54, %s902_s24 }
 0x3bb   :  { %v312_v55 = vpop.permute.xlu1 %311 }
 0x3bc   :  { %798 = vmatmul.mubr.msk.f32.vlgmr.msra.gmra.mrb[4].mxu1 %vm67_vm0, %v312_v55 }
 0x3bd   :  { %853 = vmatpush3.bf16.msra.mxu1 %v971_v7  ;;  %819 = vmatprep.mubr.msk.f32.mxu1 %vm899_vm1, %v900_v13 }
 0x3be   :  { %854 = vmatprep.subr.bf16.mxu1 %v898_v8 }
 0x3c1   :  { %856 = vmatpush3.bf16.msra.mxu1 %v985_v12 }
 0x48f   :  { %v381_v56 = vpop.f32.mrb[4].mxu1 }
 0x490   :  { %v385_v57 = vadd.f32 %v381_v56, %v196_v40  ;;  %v799_v58 = vpop.f32.mrb[5].mxu1 }
 0x492   :  { %v719_v59 = vmul.f32 -1.442695, %v385_v57 }
 0x494   :  { %880 = vpow2.f32 %v719_v59 }
 0x49e   :  { %v881_v60 = vpop.eup %880 }
 0x49f   :  { %v389_v61 = vadd.f32 1.0, %v881_v60 }
 0x4a1   :  { %882 = vrcp.f32 %v389_v61 }
 0x4ab   :  { %v883_v62 = vpop.eup %882 }
 0x4ac   :  { %v392_v63 = vmul.f32 2.0, %v883_v62  ;;  %v394_v3 = vmul.f32 %v883_v62, %v303_v51 }
 0x4ae   :  { %v720_v0 = vadd.f32 -1.0, %v392_v63 }
 0x4b0   :  { %396 = vrot.lane.b32.xlu0 %v720_v0, %s901_s5 }
 0x522   :  { %v397_v1 = vpop.permute.xlu0 %396 }
 0x523   :  { %v399_v2 = vmul.f32 %v883_v62, %v397_v1 }
 0x525   :  { %401 = vrot.lane.b32.xlu1 %v399_v2, %s901_s5 }
 0x597   :  { %v402_v4 = vpop.permute.xlu1 %401 }
 0x598   :  { %v404_v5 = vadd.f32 %v402_v4, %v394_v3 }
 0x59a   :  { %884 = vtanh.f32 %v404_v5 }
 0x5a4   :  { %v885_v6 = vpop.eup %884 }
 0x5a5   :  { %407 = vrot.lane.b32.xlu0 %v885_v6, %s901_s5 }
 0x617   :  { %v408_v7 = vpop.permute.xlu0 %407 }
 0x618   :  { %v410_v9 = vmul.f32 %v883_v62, %v408_v7 }
 0x61a   :  { %412 = vrot.lane.b32.xlu1 %v410_v9, %s902_s24 }
 0x68c   :  { %v413_v10 = vpop.permute.xlu1 %412 }
 0x68d   :  { %809 = vmatmul.mubr.msk.f32.vlgmr.msra.gmra.mrb[6].mxu0 %vm67_vm0, %v413_v10 }
 0x68e   :  { %830 = vmatprep.mubr.msk.f32.mxu0 %vm899_vm1, %v900_v13 }
 0x760   :  { %v482_v11 = vpop.f32.mrb[6].mxu0 }
 0x761   :  { %v486_v12 = vadd.f32 %v482_v11, %v1013_v33  ;;  %v810_v14 = vpop.f32.mrb[7].mxu0 }
 0x763   :  { %v722_v15 = vmul.f32 -1.442695, %v486_v12 }
 0x765   :  { %886 = vpow2.f32 %v722_v15 }
 0x76f   :  { %v887_v16 = vpop.eup %886 }
 0x770   :  { %v490_v17 = vadd.f32 1.0, %v887_v16 }
 0x772   :  { %888 = vrcp.f32 %v490_v17 }
 0x77c   :  { %v889_v18 = vpop.eup %888 }
 0x77d   :  { %v493_v19 = vmul.f32 2.0, %v889_v18  ;;  %v495_v23 = vmul.f32 %v889_v18, %v404_v5 }
 0x77f   :  { %v723_v20 = vadd.f32 -1.0, %v493_v19 }
 0x781   :  { %497 = vrot.lane.b32.xlu0 %v723_v20, %s901_s5 }
 0x7f3   :  { %v498_v21 = vpop.permute.xlu0 %497 }
 0x7f4   :  { %v500_v22 = vmul.f32 %v889_v18, %v498_v21 }
 0x7f6   :  { %502 = vrot.lane.b32.xlu1 %v500_v22, %s901_s5 }
 0x868   :  { %v503_v13 = vpop.permute.xlu1 %502 }
 0x869   :  { %v505_v24 = vadd.f32 %v503_v13, %v495_v23 }
 0x86b   :  { %890 = vtanh.f32 %v505_v24 }
 0x875   :  { %v891_v25 = vpop.eup %890 }
 0x876   :  { %508 = vrot.lane.b32.xlu0 %v891_v25, %s901_s5 }
 0x8e8   :  { %v509_v26 = vpop.permute.xlu0 %508 }
 0x8e9   :  { %v511_v27 = vmul.f32 %v889_v18, %v509_v26 }
 0x8eb   :  { %513 = vrot.lane.b32.xlu1 %v511_v27, %s902_s24 }
 0x95d   :  { %v514_v28 = vpop.permute.xlu1 %513 }
 0x95e   :  { %820 = vmatmul.mubr.msk.f32.vlgmr.msra.gmra.mrb[6].mxu1 %vm67_vm0, %v514_v28 }
 0xa31   :  { %v583_v29 = vpop.f32.mrb[6].mxu1 }
 0xa32   :  { %v587_v30 = vadd.f32 %v583_v29, %v1015_v37  ;;  %v821_v31 = vpop.f32.mrb[7].mxu1  ;;  %v613_v37 = vld [vmem:[%s1071_s6] sm:$0xff] }
 0xa33   :  { %v858_v46 = vpack.c.bf16 %v614_v44, %v613_v37 }
 0xa34   :  { %v725_v32 = vmul.f32 -1.442695, %v587_v30 }
 0xa35   :  { %859 = vmatpush3.bf16.msra.mxu0 %v858_v46 }
 0xa36   :  { %892 = vpow2.f32 %v725_v32  ;;  %860 = vmatprep.subr.bf16.mxu0 %v898_v8 }
 0xa39   :  { %862 = vmatpush3.bf16.msra.mxu0 %v861_v48 }
 0xa40   :  { %v893_v33 = vpop.eup %892 }
 0xa41   :  { %v591_v34 = vadd.f32 1.0, %v893_v33 }
 0xa43   :  { %894 = vrcp.f32 %v591_v34 }
 0xa4d   :  { %v895_v35 = vpop.eup %894 }
 0xa4e   :  { %v594_v36 = vmul.f32 2.0, %v895_v35  ;;  %v596_v41 = vmul.f32 %v895_v35, %v505_v24 }
 0xa50   :  { %v726_v38 = vadd.f32 -1.0, %v594_v36 }
 0xa52   :  { %598 = vrot.lane.b32.xlu0 %v726_v38, %s901_s5 }
 0xac4   :  { %v599_v39 = vpop.permute.xlu0 %598 }
 0xac5   :  { %v601_v40 = vmul.f32 %v895_v35, %v599_v39 }
 0xac7   :  { %603 = vrot.lane.b32.xlu1 %v601_v40, %s901_s5 }
 0xb39   :  { %v604_v42 = vpop.permute.xlu1 %603 }
 0xb3a   :  { %v606_v43 = vadd.f32 %v604_v42, %v596_v41 }
 0xb3c   :  { %896 = vtanh.f32 %v606_v43 }
 0xb46   :  { %v897_v49 = vpop.eup %896 }
 0xb47   :  { %609 = vrot.lane.b32.xlu0 %v897_v49, %s901_s5 }
 0xbb9   :  { %v610_v50 = vpop.permute.xlu0 %609 }
 0xbba   :  { %v612_v51 = vmul.f32 %v895_v35, %v610_v50 }
 0xbbc   :  { %625 = vrot.lane.b32.xlu1 %v612_v51, %s902_s24 }
 0xc2e   :  { %v626_v52 = vpop.permute.xlu1 %625 }
 0xc2f   :  { %831 = vmatmul.mubr.msk.f32.vlgmr.msra.gmra.mrb[8].mxu0 %vm67_vm0, %v626_v52 }
 0xd02   :  { %v695_v54 = vpop.f32.mrb[8].mxu0 }
 0xd03   :  { %v696_v55 = vadd.f32 %v727_v53, %v695_v54  ;;  %v832_v56 = vpop.f32.mrb[9].mxu0 }
 0xd05   :  { %699 = vst [vmem:[%s1073_s8] sm:$0xff] %v696_v55 }

</bundles_post_ra>
